<compile_context>
chip_gen: v7x
topology: tpu7x:2x2x1
jax: 0.10.0
libtpu: 0.0.40
codegen_flags: <defaults>
</compile_context>

<pallas_src>
import functools

import jax
import jax.numpy as jnp
from jax.experimental import pallas as pl
from jax.experimental.pallas import tpu as pltpu


def _mlp_kernel(xt_ref, w1_ref, b1_ref, w2_ref, b2_ref, w3_ref, b3_ref, o_ref):
    # xt_ref: [in_dim, bb]   w1: [hid, in_dim]   b1: [hid, 1]
    # All matmuls accumulate in f32 on the MXU; bias-add + tanh stay in f32
    # (tanh lowers to the EUP slot, essentially free next to the matmuls).
    h = jnp.dot(w1_ref[...], xt_ref[...], preferred_element_type=jnp.float32)
    h = jnp.tanh(h + b1_ref[...])                      # [hid, bb]
    h = jnp.dot(w2_ref[...], h.astype(w2_ref.dtype),
                preferred_element_type=jnp.float32)
    h = jnp.tanh(h + b2_ref[...])                      # [hid, bb]
    out = jnp.dot(w3_ref[...], h.astype(w3_ref.dtype),
                  preferred_element_type=jnp.float32) + b3_ref[...]
    o_ref[...] = out.astype(o_ref.dtype)               # [out_dim, bb], lane-dense store


def nn_pinn_forward(x, params, *, block_batch=2048, use_bf16=False):
    """Pallas forward pass of NN_PINN.

    x:      [B, input_dim] float32
    params: PyTorch-layout weights: w1 [hid, in], b1 [hid],
            w2 [hid, hid], b2 [hid], w3 [out, hid], b3 [out].
    block_batch: rows per grid step (rounded to a multiple of 128; sized well
                 under the v7x 32 MiB scoped-VMEM default).
    use_bf16: optionally cast x / weights to bf16 at the call boundary
              (f32 accumulation, f32 bias/tanh) to halve HBM traffic.
    """
    B, in_dim = x.shape
    hid = params["w1"].shape[0]
    out_dim = params["w3"].shape[0]

    # block_batch on the lane axis -> multiple of 128; don't exceed padded batch.
    block_batch = max(128, (int(block_batch) // 128) * 128)
    b_pad_to = pl.cdiv(B, 128) * 128
    block_batch = min(block_batch, b_pad_to)
    B_pad = pl.cdiv(B, block_batch) * block_batch
    grid = (B_pad // block_batch,)

    # Wrapper-side layout plumbing: pad batch, put it on the lane axis.
    x_p = jnp.pad(x, ((0, B_pad - B), (0, 0)))
    x_t = jnp.transpose(x_p)                             # [in_dim, B_pad]

    w1, w2, w3 = params["w1"], params["w2"], params["w3"]
    if use_bf16:
        x_t = x_t.astype(jnp.bfloat16)
        w1 = w1.astype(jnp.bfloat16)
        w2 = w2.astype(jnp.bfloat16)
        w3 = w3.astype(jnp.bfloat16)

    # Biases as [features, 1] so they broadcast over the lane (batch) axis in f32.
    b1 = params["b1"].reshape(hid, 1).astype(jnp.float32)
    b2 = params["b2"].reshape(hid, 1).astype(jnp.float32)
    b3 = params["b3"].reshape(out_dim, 1).astype(jnp.float32)

    out_t = pl.pallas_call(
        _mlp_kernel,
        out_shape=jax.ShapeDtypeStruct((out_dim, B_pad), jnp.float32),
        grid_spec=pltpu.PrefetchScalarGridSpec(
            num_scalar_prefetch=0,
            grid=grid,
            in_specs=[
                # x^T: tiled over batch on the lane axis.
                pl.BlockSpec((in_dim, block_batch), lambda i: (0, i)),
                # weights / biases: full (tiny) arrays, same block every step.
                pl.BlockSpec((hid, in_dim), lambda i: (0, 0)),
                pl.BlockSpec((hid, 1), lambda i: (0, 0)),
                pl.BlockSpec((hid, hid), lambda i: (0, 0)),
                pl.BlockSpec((hid, 1), lambda i: (0, 0)),
                pl.BlockSpec((out_dim, hid), lambda i: (0, 0)),
                pl.BlockSpec((out_dim, 1), lambda i: (0, 0)),
            ],
            out_specs=pl.BlockSpec((out_dim, block_batch), lambda i: (0, i)),
        ),
        compiler_params=pltpu.CompilerParams(
            dimension_semantics=("parallel",),
        ),
    )(x_t, w1, b1, w2, b2, w3, b3)

    # Back to [B, out_dim].
    return jnp.transpose(out_t)[:B]


def init_params(key, input_dim, hid_dim, output_dim):
    """Deterministic init matching nn.Linear shapes ([out_features, in_features])."""
    k = jax.random.split(key, 6)

    def uniform(kk, shape, fan_in):
        bound = 1.0 / jnp.sqrt(fan_in)
        return jax.random.uniform(kk, shape, jnp.float32, -bound, bound)

    return {
        "w1": uniform(k[0], (hid_dim, input_dim), input_dim),
        "b1": uniform(k[1], (hid_dim,), input_dim),
        "w2": uniform(k[2], (hid_dim, hid_dim), hid_dim),
        "b2": uniform(k[3], (hid_dim,), hid_dim),
        "w3": uniform(k[4], (output_dim, hid_dim), hid_dim),
        "b3": uniform(k[5], (output_dim,), hid_dim),
    }


def reference_forward(x, p):
    h = jnp.tanh(x @ p["w1"].T + p["b1"])
    h = jnp.tanh(h @ p["w2"].T + p["b2"])
    return h @ p["w3"].T + p["b3"]


if __name__ == "__main__":
    input_dim, hid_dim, output_dim = 4, 32, 2
    batch = 8

    key = jax.random.PRNGKey(0)
    kx, kp = jax.random.split(key)
    x = jax.random.normal(kx, (batch, input_dim), jnp.float32)
    params = init_params(kp, input_dim, hid_dim, output_dim)

    fwd = functools.partial(nn_pinn_forward, block_batch=2048)
    out = jax.block_until_ready(fwd(x, params))

    ref = reference_forward(x, params)
    assert out.shape == (batch, output_dim), out.shape
    assert jnp.allclose(out, ref, atol=1e-5, rtol=1e-5)

    # Also exercise a multi-block grid (batch padded across >1 grid steps).
    xb = jax.random.normal(kx, (1000, input_dim), jnp.float32)
    outb = jax.block_until_ready(
        nn_pinn_forward(xb, params, block_batch=256))
    refb = reference_forward(xb, params)
    assert outb.shape == (1000, output_dim)
    assert jnp.allclose(outb, refb, atol=1e-5, rtol=1e-5)

    print("KERNEL_OK")
</pallas_src>

<mosaic_0001>
module attributes {stable_mosaic.version = 11 : i64} {
  func.func @_mlp_kernel(%arg0: i32, %arg1: memref<4x128xf32, #tpu.memory_space<vmem>>, %arg2: memref<32x4xf32, #tpu.memory_space<vmem>>, %arg3: memref<32x1xf32, #tpu.memory_space<vmem>>, %arg4: memref<32x32xf32, #tpu.memory_space<vmem>>, %arg5: memref<32x1xf32, #tpu.memory_space<vmem>>, %arg6: memref<2x32xf32, #tpu.memory_space<vmem>>, %arg7: memref<2x1xf32, #tpu.memory_space<vmem>>, %arg8: memref<2x128xf32, #tpu.memory_space<vmem>>) attributes {dimension_semantics = [#tpu.dimension_semantics<parallel>], iteration_bounds = array<i64: 1>, scalar_prefetch = 0 : i64, scratch_operands = 0 : i64, tpu.core_type = #tpu.core_type<tc>, window_params = [{transform_indices = @transform_0, window_bounds = array<i64: 4, 128>}, {pipeline_mode = #tpu.pipeline_mode<synchronous>, transform_indices = @transform_1, window_bounds = array<i64: 32, 4>}, {pipeline_mode = #tpu.pipeline_mode<synchronous>, transform_indices = @transform_2, window_bounds = array<i64: 32, 1>}, {pipeline_mode = #tpu.pipeline_mode<synchronous>, transform_indices = @transform_3, window_bounds = array<i64: 32, 32>}, {pipeline_mode = #tpu.pipeline_mode<synchronous>, transform_indices = @transform_4, window_bounds = array<i64: 32, 1>}, {pipeline_mode = #tpu.pipeline_mode<synchronous>, transform_indices = @transform_5, window_bounds = array<i64: 2, 32>}, {pipeline_mode = #tpu.pipeline_mode<synchronous>, transform_indices = @transform_6, window_bounds = array<i64: 2, 1>}, {transform_indices = @transform_7, window_bounds = array<i64: 2, 128>}]} {
    %c0 = arith.constant 0 : index
    %c0_0 = arith.constant 0 : index
    %0 = vector.load %arg2[%c0, %c0_0] : memref<32x4xf32, #tpu.memory_space<vmem>>, vector<32x4xf32>
    %c0_1 = arith.constant 0 : index
    %c0_2 = arith.constant 0 : index
    %1 = vector.load %arg1[%c0_1, %c0_2] : memref<4x128xf32, #tpu.memory_space<vmem>>, vector<4x128xf32>
    %cst = arith.constant dense<0.000000e+00> : vector<32x128xf32>
    %2 = tpu.matmul %0, %1, %cst {dimension_numbers = #tpu.dot_dimension_numbers<[1], [0], [0], [1], [0, 0, 1, 1], [], []>} : vector<32x4xf32>, vector<4x128xf32>, vector<32x128xf32> -> vector<32x128xf32>
    %c0_3 = arith.constant 0 : index
    %c0_4 = arith.constant 0 : index
    %3 = vector.load %arg3[%c0_3, %c0_4] : memref<32x1xf32, #tpu.memory_space<vmem>>, vector<32x1xf32>
    %4 = vector.broadcast %3 : vector<32x1xf32> to vector<32x128xf32>
    %5 = arith.addf %2, %4 : vector<32x128xf32>
    %6 = math.tanh %5 : vector<32x128xf32>
    %c0_5 = arith.constant 0 : index
    %c0_6 = arith.constant 0 : index
    %7 = vector.load %arg4[%c0_5, %c0_6] : memref<32x32xf32, #tpu.memory_space<vmem>>, vector<32x32xf32>
    %cst_7 = arith.constant dense<0.000000e+00> : vector<32x128xf32>
    %8 = tpu.matmul %7, %6, %cst_7 {dimension_numbers = #tpu.dot_dimension_numbers<[1], [0], [0], [1], [0, 0, 1, 1], [], []>} : vector<32x32xf32>, vector<32x128xf32>, vector<32x128xf32> -> vector<32x128xf32>
    %c0_8 = arith.constant 0 : index
    %c0_9 = arith.constant 0 : index
    %9 = vector.load %arg5[%c0_8, %c0_9] : memref<32x1xf32, #tpu.memory_space<vmem>>, vector<32x1xf32>
    %10 = vector.broadcast %9 : vector<32x1xf32> to vector<32x128xf32>
    %11 = arith.addf %8, %10 : vector<32x128xf32>
    %12 = math.tanh %11 : vector<32x128xf32>
    %c0_10 = arith.constant 0 : index
    %c0_11 = arith.constant 0 : index
    %13 = vector.load %arg6[%c0_10, %c0_11] : memref<2x32xf32, #tpu.memory_space<vmem>>, vector<2x32xf32>
    %cst_12 = arith.constant dense<0.000000e+00> : vector<2x128xf32>
    %14 = tpu.matmul %13, %12, %cst_12 {dimension_numbers = #tpu.dot_dimension_numbers<[1], [0], [0], [1], [0, 0, 1, 1], [], []>} : vector<2x32xf32>, vector<32x128xf32>, vector<2x128xf32> -> vector<2x128xf32>
    %c0_13 = arith.constant 0 : index
    %c0_14 = arith.constant 0 : index
    %15 = vector.load %arg7[%c0_13, %c0_14] : memref<2x1xf32, #tpu.memory_space<vmem>>, vector<2x1xf32>
    %16 = vector.broadcast %15 : vector<2x1xf32> to vector<2x128xf32>
    %17 = arith.addf %14, %16 : vector<2x128xf32>
    %c0_15 = arith.constant 0 : index
    %c0_16 = arith.constant 0 : index
    %18 = vector.load %arg8[%c0_15, %c0_16] : memref<2x128xf32, #tpu.memory_space<vmem>>, vector<2x128xf32>
    tpu.vector_store %arg8[%c0_15, %c0_16], %17 {strides = array<i32>} : memref<2x128xf32, #tpu.memory_space<vmem>>, vector<2x128xf32>,
    return
  }
  func.func @transform_0(%arg0: i32) -> (i32, i32) {
    %c0_i32 = arith.constant 0 : i32
    %c0_i32_0 = arith.constant 0 : i32
    return %c0_i32, %arg0 : i32, i32
  }
  func.func @transform_1(%arg0: i32) -> (i32, i32) {
    %c0_i32 = arith.constant 0 : i32
    %c0_i32_0 = arith.constant 0 : i32
    %c0_i32_1 = arith.constant 0 : i32
    return %c0_i32, %c0_i32_0 : i32, i32
  }
  func.func @transform_2(%arg0: i32) -> (i32, i32) {
    %c0_i32 = arith.constant 0 : i32
    %c0_i32_0 = arith.constant 0 : i32
    %c0_i32_1 = arith.constant 0 : i32
    return %c0_i32, %c0_i32_0 : i32, i32
  }
  func.func @transform_3(%arg0: i32) -> (i32, i32) {
    %c0_i32 = arith.constant 0 : i32
    %c0_i32_0 = arith.constant 0 : i32
    %c0_i32_1 = arith.constant 0 : i32
    return %c0_i32, %c0_i32_0 : i32, i32
  }
  func.func @transform_4(%arg0: i32) -> (i32, i32) {
    %c0_i32 = arith.constant 0 : i32
    %c0_i32_0 = arith.constant 0 : i32
    %c0_i32_1 = arith.constant 0 : i32
    return %c0_i32, %c0_i32_0 : i32, i32
  }
  func.func @transform_5(%arg0: i32) -> (i32, i32) {
    %c0_i32 = arith.constant 0 : i32
    %c0_i32_0 = arith.constant 0 : i32
    %c0_i32_1 = arith.constant 0 : i32
    return %c0_i32, %c0_i32_0 : i32, i32
  }
  func.func @transform_6(%arg0: i32) -> (i32, i32) {
    %c0_i32 = arith.constant 0 : i32
    %c0_i32_0 = arith.constant 0 : i32
    %c0_i32_1 = arith.constant 0 : i32
    return %c0_i32, %c0_i32_0 : i32, i32
  }
  func.func @transform_7(%arg0: i32) -> (i32, i32) {
    %c0_i32 = arith.constant 0 : i32
    %c0_i32_0 = arith.constant 0 : i32
    return %c0_i32, %arg0 : i32, i32
  }
}

</mosaic_0001>

<bundles_post_ra>
// kernel: tpu_custom_call.1
= control target key start
LH: loop header
LB: loop body
LE: loop exit
PB: predicated region body
PF: predicated region fallthrough
CT: control target
= control target key end

     0   :  { %vm69_vm0 = vcmask 1043456   ;;  %vm56_vm1 = vcmask 31744   ;;  %v509_v5 = vmov 0   ;;  %s632_s0 = inlined_call_operand.vmem [shape: f32[4,128], index: 0, kind: input, shape index: {}]   ;;  %s633_s1 = inlined_call_operand.vmem [shape: f32[32,4], index: 1, kind: input, shape index: {}]   ;;  %s634_s2 = inlined_call_operand.vmem [shape: f32[32,1], index: 2, kind: input, shape index: {}]   ;;  %s635_s3 = inlined_call_operand.vmem [shape: f32[32,32], index: 3, kind: input, shape index: {}]   ;;  %s636_s4 = inlined_call_operand.vmem [shape: f32[32,1], index: 4, kind: input, shape index: {}]   ;;  %s637_s5 = inlined_call_operand.vmem [shape: f32[2,32], index: 5, kind: input, shape index: {}]   ;;  %s638_s6 = inlined_call_operand.vmem [shape: f32[2,1], index: 6, kind: input, shape index: {}]   ;;  %s639_s7 = inlined_call_operand.hbm [shape: f32[2,128], index: 7, kind: output, shape index: {}]  }
   0x1   :  { %v31_v0 = vld [vmem:[%s632_s0] sm:$0xf]  ;;  %v28_v2 = vld [vmem:[%s633_s1 + $0x8] sm:$0xff]  ;;  %v29_v3 = vld [vmem:[%s633_s1 + $0x10] sm:$0xff]  ;;  %467 = vset.pattern.permute.xlu0 %v509_v5  ;;  %468 = vset.pattern.permute.xlu1 %v509_v5 }
   0x2   :  { %v27_v1 = vld [vmem:[%s633_s1] sm:$0xff]  ;;  %415 = vmatprep.subr.msk.mxu0 %vm69_vm0, %v31_v0  ;;  %v34_v6 = vld [vmem:[%s634_s2 + $0x10] sm:$0xff]  ;;  %v30_v7 = vld [vmem:[%s633_s1 + $0x18] sm:$0xff] }
   0x3   :  { %417 = vmatprep.mubr.msk.f32.mxu0 %vm56_vm1, %v27_v1  ;;  %v32_v4 = vld [vmem:[%s634_s2] sm:$0xff]  ;;  %416 = vmatpush3.msk.msra.mxu0 %vm69_vm0, %v31_v0  ;;  %v33_v8 = vld [vmem:[%s634_s2 + $0x8] sm:$0xff] }
   0x4   :  { %418 = vmatmul.mubr.msk.f32.vlgmr.msra.gmra.mrb[0].mxu0 %vm56_vm1, %v28_v2  ;;  %38 = vperm.xlu0 %467, %v32_v4  }
   0x5   :  { %420 = vmatprep.mubr.msk.f32.mxu0 %vm56_vm1, %v29_v3 }
   0x6   :  { %12 = vsyncpa [#allocation3], 0  ;;  %48 = vperm.xlu1 %468, %v34_v6   ;;  %v35_v9 = vld [vmem:[%s634_s2 + $0x18] sm:$0xff]  ;;  %v166_v10 = vld [vmem:[%s636_s4] sm:$0xff]  ;;  %vm190_vm2 = vcmask 261120   ;;  %v510_v37 = vmov 0.0|0.0  }
   0x7   :  { %v167_v11 = vld [vmem:[%s636_s4 + $0x8] sm:$0xff]  ;;  %v168_v12 = vld [vmem:[%s636_s4 + $0x10] sm:$0xff]  ;;  %v169_v13 = vld [vmem:[%s636_s4 + $0x18] sm:$0xff]  ;;  %456 = vmatprep.subr.bf16.mxu0 %v510_v37  ;;  %vm511_vm3 = vmmov 0   ;;  %v512_v38 = vmov 0.0   ;;  %s513_s10 = smov [#allocation2]  }
   0x8   :  { %421 = vmatmul.mubr.msk.f32.gmra.mrb[2].mxu0 %vm56_vm1, %v30_v7  ;;  %43 = vperm.xlu0 %467, %v33_v8   ;;  %v293_v14 = vld [vmem:[%s638_s6] sm:$0x3]  ;;  %v163_v34 = vld [vmem:[%s635_s3 + $0x8] sm:$0xff]  ;;  %v164_v35 = vld [vmem:[%s635_s3 + $0x10] sm:$0xff]  ;;  %s379_s0 = sshll.u32 %s513_s10, 4  ;;  %s380_s0 = int_to_ptr.vmem [resolvable:$true] %s379_s0 }
   0x9   :  { %v162_v15 = vld [vmem:[%s635_s3] sm:$0xff]  ;;  %v165_v36 = vld [vmem:[%s635_s3 + $0x18] sm:$0xff]  ;;  %445 = vmatprep.mubr.msk.f32.mxu0 %vm511_vm3, %v512_v38  ;;  %s485_s11 = scalar_lea.vmem %s380_s0, 32  ;;  %p490_p1 = scmp.lt.s32.totalorder %s380_s0, %s380_s0 }
   0xa   :  { %53 = vperm.xlu1 %468, %v35_v9   ;;  %431 = vmatprep.mubr.msk.f32.mxu1 %vm190_vm2, %v162_v15  ;;  %v292_v57 = vld [vmem:[%s637_s5] sm:$0x3]  ;;  %p486_p0 = scmp.ne.s32.totalorder %s380_s0, %s485_s11  ;;  %p491_p2 = scmp.lt.s32.totalorder %s485_s11, %s485_s11 }
   0xc   :  { %172 = vperm.xlu0 %467, %v166_v10   ;;  %p492_p3 = por %p491_p2, %p490_p1 }
   0xe   :  { %177 = vperm.xlu1 %468, %v167_v11   ;;  %p493_p4 = pnand %p492_p3, %p486_p0 }
  0x10   :  { %182 = vperm.xlu0 %467, %v168_v12  }
  0x12   :  { %187 = vperm.xlu1 %468, %v169_v13  }
  0x14   :  { %296 = vperm.xlu0 %467, %v293_v14  }
  0x83   :  { %v39_v16 = vpop.permute.xlu0 %38 }
  0x85   :  { %v49_v17 = vpop.permute.xlu1 %48 }
  0x87   :  { %v44_v18 = vpop.permute.xlu0 %43 }
  0x89   :  { %v54_v23 = vpop.permute.xlu1 %53 }
  0x8b   :  { %v173_v40 = vpop.permute.xlu0 %172 }
  0x8d   :  { %v178_v39 = vpop.permute.xlu1 %177 }
  0x8f   :  { %v183_v47 = vpop.permute.xlu0 %182 }
  0x91   :  { %v188_v45 = vpop.permute.xlu1 %187 }
  0x93   :  { %v297_v58 = vpop.permute.xlu0 %296 }
  0xd7   :  { %v419_v19 = vpop.f32.mrb[0].mxu0 }
  0xd8   :  { %v145_v20 = vadd.f32 %v419_v19, %v44_v18  ;;  %v139_v21 = vpop.f32.mrb[1].mxu0 }
  0xd9   :  { %v140_v22 = vadd.f32 %v139_v21, %v39_v16 }
  0xda   :  { %469 = vtanh.f32 %v145_v20 }
  0xdb   :  { %471 = vtanh.f32 %v140_v22  ;;  %v422_v24 = vpop.f32.mrb[2].mxu0 }
  0xdc   :  { %v155_v25 = vadd.f32 %v422_v24, %v54_v23  ;;  %v149_v26 = vpop.f32.mrb[3].mxu0 }
  0xdd   :  { %v150_v27 = vadd.f32 %v149_v26, %v49_v17 }
  0xde   :  { %473 = vtanh.f32 %v155_v25 }
  0xdf   :  { %475 = vtanh.f32 %v150_v27 }
  0xe4   :  { %v470_v28 = vpop.eup %469 }
  0xe5   :  { %v472_v29 = vpop.eup %471 }
  0xe6   :  { %v448_v30 = vpack.c.bf16 %v470_v28, %v472_v29 }
  0xe8   :  { %v474_v31 = vpop.eup %473  ;;  %449 = vmatprep.subr.bf16.mxu1 %v448_v30 }
  0xe9   :  { %v476_v32 = vpop.eup %475  ;;  %451 = vmatpush3.bf16.msra.mxu1 %v448_v30 }
  0xea   :  { %v452_v33 = vpack.c.bf16 %v474_v31, %v476_v32 }
  0xec   :  { %453 = vmatprep.subr.bf16.mxu1 %v452_v33 }
  0xed   :  { %455 = vmatpush3.bf16.msra.mxu1 %v452_v33 }
  0xf0   :  { %432 = vmatmul.mubr.msk.f32.vlgmr.msra.gmra.mrb[0].mxu1 %vm190_vm2, %v163_v34 }
  0xf1   :  { %434 = vmatprep.mubr.msk.f32.mxu1 %vm190_vm2, %v164_v35 }
  0xf4   :  { %435 = vmatmul.mubr.msk.f32.gmra.mrb[2].mxu1 %vm190_vm2, %v165_v36 }
 0x1c3   :  { %v433_v41 = vpop.f32.mrb[0].mxu1 }
 0x1c4   :  { %v275_v42 = vadd.f32 %v433_v41, %v178_v39  ;;  %v269_v43 = vpop.f32.mrb[1].mxu1 }
 0x1c5   :  { %v270_v44 = vadd.f32 %v269_v43, %v173_v40 }
 0x1c6   :  { %477 = vtanh.f32 %v275_v42 }
 0x1c7   :  { %479 = vtanh.f32 %v270_v44  ;;  %v436_v46 = vpop.f32.mrb[2].mxu1 }
 0x1c8   :  { %v285_v48 = vadd.f32 %v436_v46, %v188_v45  ;;  %v279_v49 = vpop.f32.mrb[3].mxu1 }
 0x1c9   :  { %v280_v50 = vadd.f32 %v279_v49, %v183_v47 }
 0x1ca   :  { %481 = vtanh.f32 %v285_v48 }
 0x1cb   :  { %483 = vtanh.f32 %v280_v50 }
 0x1d0   :  { %v478_v51 = vpop.eup %477 }
 0x1d1   :  { %v480_v52 = vpop.eup %479 }
 0x1d2   :  { %v457_v53 = vpack.c.bf16 %v478_v51, %v480_v52 }
 0x1d4   :  { %v482_v54 = vpop.eup %481  ;;  %458 = vmatpush3.bf16.msra.mxu0 %v457_v53 }
 0x1d5   :  { %v484_v55 = vpop.eup %483  ;;  %459 = vmatprep.subr.bf16.mxu0 %v510_v37 }
 0x1d6   :  { %v460_v56 = vpack.c.bf16 %v482_v54, %v484_v55 }
 0x1d8   :  { %461 = vmatpush3.bf16.msra.mxu0 %v460_v56 }
 0x1db   :  { %446 = vmatmul.mubr.msk.f32.vlgmr.msra.gmra.mrb[4].mxu0 %vm190_vm2, %v292_v57 }
 0x2ae   :  { %v368_v59 = vpop.f32.mrb[4].mxu0 }
 0x2af   :  { %v369_v60 = vadd.f32 %v368_v59, %v297_v58  ;;  %v447_v61 = vpop.f32.mrb[5].mxu0 }
 0x2b1   :  { %372 = vst [vmem:[#allocation2] sm:$0x3] %v369_v60 }
 0x2b2   :  { %496 = shalt.err (!%p493_p4)
}
 0x2b3   :  { %s497_s5 = scalar_lea.hbm %s639_s7, 32 }
 0x2b4   :  { %p498_p5 = scmp.ne.s32.totalorder %s639_s7, %s497_s5  ;;  %p501_p6 = scmp.lt.u32.totalorder %s497_s5, %s639_s7 }
 0x2b6   :  { %p503_p7 = pnand %p501_p6, %p498_p5 }
 0x2b8   :  { %506 = shalt.err (!%p503_p7)
}
 0x2b9   :  { %382 = dma.vmem_to_hbm [thread:$0]  %s380_s0, 32, %s639_s7, [#allocation3]  }
 0x2ba   :  { %507 = dma.done.wait [#allocation3], 32  }
 0x2bb   :  { %508 = vsyncadd [#allocation3], 4294967264 }
 0x2bc   :  { %386 = vsyncpa [#allocation3], 1 }

</bundles_post_ra>
